<compile_context>
chip_gen: v7x
topology: tpu7x:2x2x1
jax: 0.10.0
libtpu: 0.0.40
codegen_flags: <defaults>
</compile_context>

<pallas_src>
import jax
import jax.numpy as jnp
import numpy as np
from jax.experimental import pallas as pl
from jax.experimental.pallas import tpu as pltpu


def patch_embedding_kernel(x_ref, wt_ref, bpe_ref, epo_ref, cls_ref, o_ref):
    """One grid step = TB batch rows; writes the final output block once.

    x_ref:   (TB, P, Din)  input patches, native dtype (cast to bf16 here).
    wt_ref:  (Din, E) bf16 linear weight, pre-transposed (W.T).
    bpe_ref: (P, E)   f32  bias + pos_enc[2::2]     (projection slots).
    epo_ref: (P, E)   f32  emb[1:] + pos_enc[1::2]  (patch-number slots).
    cls_ref: (1, E)   f32  emb[0]  + pos_enc[0]     (cls slot).
    o_ref:   (TB, 2P+1, E) final interleaved output.
    """
    TB, P, Din = x_ref.shape
    E = wt_ref.shape[1]

    # Hot path: ONE big-M MXU matmul over all TB*P patch rows, f32 accumulate.
    # bf16 cast happens in-kernel (no wrapper-side convert pass over x).
    xb = x_ref[...].reshape(TB * P, Din).astype(jnp.bfloat16)
    y = jnp.dot(xb, wt_ref[...], preferred_element_type=jnp.float32)   # (TB*P, E)

    # Fused f32 epilogue: + bias + even-position positional encoding.
    y = y.reshape(TB, P, E) + bpe_ref[...][None]                        # (TB, P, E)

    # Batch-invariant odd-position rows, broadcast over the TB batch rows.
    epo = jnp.broadcast_to(epo_ref[...][None], (TB, P, E))              # (TB, P, E)

    # In-vreg interleave into the final token order, then lane-dense stores:
    #   row 0          : cls slot (batch-invariant)
    #   rows 1,3,5,... : patch-number embeddings (+pos)
    #   rows 2,4,6,... : linear projections      (+bias+pos)
    body = jnp.stack([epo, y], axis=2).reshape(TB, 2 * P, E)            # (TB, 2P, E)
    o_ref[:, 0:1, :] = jnp.broadcast_to(cls_ref[...][None],
                                        (TB, 1, E)).astype(o_ref.dtype)
    o_ref[:, 1:, :] = body.astype(o_ref.dtype)


def _pick_batch_block(B, P, *, target_rows=1024, min_grid_steps=2):
    """Pick the batch block TB (a divisor of B).

    - TB*P <= target_rows matmul rows per step (raise target_rows on
      v5e/v6e's 128 MiB VMEM; the explicit vmem budget below keeps v7x safe).
    - Keep >= min_grid_steps grid steps whenever B allows, so the "parallel"
      batch axis shards across both v7x TensorCores.
    - Prefer TB*P % 8 == 0 so the in-kernel (TB,P,Din)->(TB*P,Din) reshape is
      a free sublane-contiguous collapse, not a paid relayout.
    """
    cap = max(1, min(B, max(1, target_rows // max(P, 1))))
    if B >= min_grid_steps:
        cap = min(cap, max(1, B // min_grid_steps))
    best, best_aligned = 1, None
    for tb in range(1, cap + 1):
        if B % tb == 0:
            best = tb
            if (tb * P) % 8 == 0:
                best_aligned = tb
    # TODO(synk): pad B / allow a ragged last block when B is prime or has no
    # divisor near the target instead of degrading to TB=1.
    return best_aligned if best_aligned is not None else best


def patch_embedding_forward(x, w, b, emb_table, pos_enc, *,
                            target_rows=1024, out_dtype=None):
    """x: (B, P, Din); w: (E, Din); b: (E,); emb_table: (P+1, E);
    pos_enc: (1, 2P+1, E).  Returns the full (B, 2P+1, E) output."""
    B, P, Din = x.shape
    E = w.shape[0]
    S = 2 * P + 1
    out_dtype = x.dtype if out_dtype is None else out_dtype
    pos = pos_enc.reshape(S, E).astype(jnp.float32)

    # Batch-invariant epilogue slabs (f32).  In production these (and the
    # pre-transposed bf16 weight) would be precomputed once as parameters so
    # the per-call wrapper does no convert/transpose work.
    bpe = b.astype(jnp.float32)[None, :] + pos[2::2]                 # (P, E)
    epo = emb_table.astype(jnp.float32)[1:] + pos[1::2]              # (P, E)
    cls = emb_table[0:1].astype(jnp.float32) + pos[0:1]              # (1, E)
    wt = w.T.astype(jnp.bfloat16)                                    # (Din, E)

    TB = _pick_batch_block(B, P, target_rows=target_rows)
    grid = (B // TB,)

    # Explicit VMEM budget: double-buffered x + output blocks, single-buffered
    # grid-invariant operands, plus in-kernel temporaries; 2x headroom,
    # capped at 64 MiB so the same tile never overshoots v7x's smaller VMEM.
    x_bytes = TB * P * Din * jnp.dtype(x.dtype).itemsize
    o_bytes = TB * S * E * jnp.dtype(out_dtype).itemsize
    const_bytes = Din * E * 2 + (2 * P + 8) * E * 4
    tmp_bytes = TB * P * Din * 2 + TB * P * E * 4 + TB * 2 * P * E * 4
    vmem_limit = int(min(max(2 * (2 * x_bytes + 2 * o_bytes
                                  + const_bytes + tmp_bytes), 16 << 20),
                         64 << 20))

    return pl.pallas_call(
        patch_embedding_kernel,
        out_shape=jax.ShapeDtypeStruct((B, S, E), out_dtype),
        grid=grid,
        in_specs=[
            pl.BlockSpec((TB, P, Din), lambda i: (i, 0, 0)),
            pl.BlockSpec((Din, E), lambda i: (0, 0),
                         pipeline_mode=pl.Buffered(1)),
            pl.BlockSpec((P, E), lambda i: (0, 0),
                         pipeline_mode=pl.Buffered(1)),
            pl.BlockSpec((P, E), lambda i: (0, 0),
                         pipeline_mode=pl.Buffered(1)),
            pl.BlockSpec((1, E), lambda i: (0, 0),
                         pipeline_mode=pl.Buffered(1)),
        ],
        out_specs=pl.BlockSpec((TB, S, E), lambda i: (i, 0, 0)),
        compiler_params=pltpu.CompilerParams(
            dimension_semantics=("parallel",),
            vmem_limit_bytes=vmem_limit),
    )(x, wt, bpe, epo, cls)


if __name__ == "__main__":
    # Small shapes consistent with the module: batch=2, num_patches=8,
    # input_size=64 (flattened patch dim), embed_size=128.
    B, P, Din, E = 2, 8, 64, 128

    key = jax.random.PRNGKey(0)
    kx, kw, kb, ke, kp = jax.random.split(key, 5)
    x = jax.random.normal(kx, (B, P, Din), jnp.float32)
    # nn.Linear(input_size, embed_size): weight (E, Din), bias (E,)
    w = jax.random.normal(kw, (E, Din), jnp.float32) * 0.02
    b = jax.random.normal(kb, (E,), jnp.float32) * 0.02
    # nn.Embedding(num_patches + 1, embed_size)
    emb_table = jax.random.normal(ke, (P + 1, E), jnp.float32) * 0.02
    # positional_encoding parameter of shape (1, 2P+1, E)
    pos_enc = jax.random.normal(kp, (1, 2 * P + 1, E), jnp.float32) * 0.02

    out = jax.block_until_ready(patch_embedding_forward(x, w, b, emb_table, pos_enc))

    # Pure-JAX reference of the PyTorch forward (same bf16-MXU matmul path
    # with f32 accumulation and f32 epilogue, so comparison is apples-to-apples).
    y = jnp.dot(x.reshape(B * P, Din).astype(jnp.bfloat16),
                w.T.astype(jnp.bfloat16),
                preferred_element_type=jnp.float32).reshape(B, P, E) + b
    pe = emb_table                                                   # tokens [0, 1..P]
    inter = jnp.stack(
        [jnp.broadcast_to(pe[1:], (B, P, E)), y], axis=2).reshape(B, 2 * P, E)
    ref = jnp.concatenate(
        [jnp.broadcast_to(pe[0:1], (B, 1, E)), inter], axis=1) + pos_enc

    np.testing.assert_allclose(np.asarray(out), np.asarray(ref),
                               rtol=2e-3, atol=2e-3)
    print("KERNEL_OK")
</pallas_src>

<mosaic_0001>
module attributes {stable_mosaic.version = 11 : i64} {
  func.func @patch_embedding_kernel(%arg0: i32, %arg1: memref<1x8x64xf32, #tpu.memory_space<vmem>>, %arg2: memref<64x128xbf16, #tpu.memory_space<vmem>>, %arg3: memref<8x128xf32, #tpu.memory_space<vmem>>, %arg4: memref<8x128xf32, #tpu.memory_space<vmem>>, %arg5: memref<1x128xf32, #tpu.memory_space<vmem>>, %arg6: memref<1x17x128xf32, #tpu.memory_space<vmem>>) attributes {dimension_semantics = [#tpu.dimension_semantics<parallel>], iteration_bounds = array<i64: 2>, scalar_prefetch = 0 : i64, scratch_operands = 0 : i64, tpu.core_type = #tpu.core_type<tc>, window_params = [{transform_indices = @transform_0, window_bounds = array<i64: 1, 8, 64>}, {pipeline_mode = #tpu.pipeline_mode<synchronous>, transform_indices = @transform_1, window_bounds = array<i64: 64, 128>}, {pipeline_mode = #tpu.pipeline_mode<synchronous>, transform_indices = @transform_2, window_bounds = array<i64: 8, 128>}, {pipeline_mode = #tpu.pipeline_mode<synchronous>, transform_indices = @transform_3, window_bounds = array<i64: 8, 128>}, {pipeline_mode = #tpu.pipeline_mode<synchronous>, transform_indices = @transform_4, window_bounds = array<i64: 1, 128>}, {transform_indices = @transform_5, window_bounds = array<i64: 1, 17, 128>}]} {
    %c0 = arith.constant 0 : index
    %c0_0 = arith.constant 0 : index
    %c0_1 = arith.constant 0 : index
    %0 = vector.load %arg1[%c0, %c0_0, %c0_1] : memref<1x8x64xf32, #tpu.memory_space<vmem>>, vector<1x8x64xf32>
    %1 = vector.shape_cast %0 : vector<1x8x64xf32> to vector<8x64xf32>
    %2 = arith.truncf %1 : vector<8x64xf32> to vector<8x64xbf16>
    %c0_2 = arith.constant 0 : index
    %c0_3 = arith.constant 0 : index
    %3 = vector.load %arg2[%c0_2, %c0_3] : memref<64x128xbf16, #tpu.memory_space<vmem>>, vector<64x128xbf16>
    %cst = arith.constant dense<0.000000e+00> : vector<8x128xf32>
    %4 = tpu.matmul %2, %3, %cst {dimension_numbers = #tpu.dot_dimension_numbers<[1], [0], [0], [1], [0, 0, 1, 1], [], []>} : vector<8x64xbf16>, vector<64x128xbf16>, vector<8x128xf32> -> vector<8x128xf32>
    %5 = vector.shape_cast %4 : vector<8x128xf32> to vector<1x8x128xf32>
    %c0_4 = arith.constant 0 : index
    %c0_5 = arith.constant 0 : index
    %6 = vector.load %arg3[%c0_4, %c0_5] : memref<8x128xf32, #tpu.memory_space<vmem>>, vector<8x128xf32>
    %7 = vector.shape_cast %6 : vector<8x128xf32> to vector<1x8x128xf32>
    %8 = arith.addf %5, %7 : vector<1x8x128xf32>
    %c0_6 = arith.constant 0 : index
    %c0_7 = arith.constant 0 : index
    %9 = vector.load %arg4[%c0_6, %c0_7] : memref<8x128xf32, #tpu.memory_space<vmem>>, vector<8x128xf32>
    %10 = vector.shape_cast %9 : vector<8x128xf32> to vector<1x8x128xf32>
    %11 = vector.shape_cast %10 : vector<1x8x128xf32> to vector<1x8x1x128xf32>
    %12 = vector.shape_cast %8 : vector<1x8x128xf32> to vector<1x8x1x128xf32>
    %13 = tpu.concatenate %11, %12 in 2 : vector<1x8x1x128xf32>, vector<1x8x1x128xf32> -> vector<1x8x2x128xf32>
    %14 = vector.shape_cast %13 : vector<1x8x2x128xf32> to vector<1x16x128xf32>
    %c0_8 = arith.constant 0 : index
    %c0_9 = arith.constant 0 : index
    %15 = vector.load %arg5[%c0_8, %c0_9] : memref<1x128xf32, #tpu.memory_space<vmem>>, vector<1x128xf32>
    %16 = vector.shape_cast %15 : vector<1x128xf32> to vector<1x1x128xf32>
    %c0_10 = arith.constant 0 : index
    %c0_11 = arith.constant 0 : index
    %c0_12 = arith.constant 0 : index
    %17 = vector.load %arg6[%c0_10, %c0_11, %c0_12] : memref<1x17x128xf32, #tpu.memory_space<vmem>>, vector<1x1x128xf32>
    tpu.vector_store %arg6[%c0_10, %c0_11, %c0_12], %16 {strides = array<i32>} : memref<1x17x128xf32, #tpu.memory_space<vmem>>, vector<1x1x128xf32>,
    %c0_13 = arith.constant 0 : index
    %c1 = arith.constant 1 : index
    %c0_14 = arith.constant 0 : index
    %18 = vector.load %arg6[%c0_13, %c1, %c0_14] : memref<1x17x128xf32, #tpu.memory_space<vmem>>, vector<1x16x128xf32>
    tpu.vector_store %arg6[%c0_13, %c1, %c0_14], %14 {strides = array<i32>} : memref<1x17x128xf32, #tpu.memory_space<vmem>>, vector<1x16x128xf32>,
    return
  }
  func.func @transform_0(%arg0: i32) -> (i32, i32, i32) {
    %c0_i32 = arith.constant 0 : i32
    %c0_i32_0 = arith.constant 0 : i32
    %c0_i32_1 = arith.constant 0 : i32
    return %arg0, %c0_i32, %c0_i32_0 : i32, i32, i32
  }
  func.func @transform_1(%arg0: i32) -> (i32, i32) {
    %c0_i32 = arith.constant 0 : i32
    %c0_i32_0 = arith.constant 0 : i32
    %c0_i32_1 = arith.constant 0 : i32
    return %c0_i32, %c0_i32_0 : i32, i32
  }
  func.func @transform_2(%arg0: i32) -> (i32, i32) {
    %c0_i32 = arith.constant 0 : i32
    %c0_i32_0 = arith.constant 0 : i32
    %c0_i32_1 = arith.constant 0 : i32
    return %c0_i32, %c0_i32_0 : i32, i32
  }
  func.func @transform_3(%arg0: i32) -> (i32, i32) {
    %c0_i32 = arith.constant 0 : i32
    %c0_i32_0 = arith.constant 0 : i32
    %c0_i32_1 = arith.constant 0 : i32
    return %c0_i32, %c0_i32_0 : i32, i32
  }
  func.func @transform_4(%arg0: i32) -> (i32, i32) {
    %c0_i32 = arith.constant 0 : i32
    %c0_i32_0 = arith.constant 0 : i32
    %c0_i32_1 = arith.constant 0 : i32
    return %c0_i32, %c0_i32_0 : i32, i32
  }
  func.func @transform_5(%arg0: i32) -> (i32, i32, i32) {
    %c0_i32 = arith.constant 0 : i32
    %c0_i32_0 = arith.constant 0 : i32
    %c0_i32_1 = arith.constant 0 : i32
    return %arg0, %c0_i32, %c0_i32_0 : i32, i32, i32
  }
}

</mosaic_0001>

<bundles_post_ra>
// kernel: tpu_custom_call.1
= control target key start
LH: loop header
LB: loop body
LE: loop exit
PB: predicated region body
PF: predicated region fallthrough
CT: control target
= control target key end

     0   :  { %10 = vsyncpa [#allocation3], 0  ;;  %s1106_s0 = inlined_call_operand.hbm [shape: f32[2,8,64], index: 0, kind: input, shape index: {}]   ;;  %s1107_s1 = inlined_call_operand.hbm [shape: bf16[64,128], index: 1, kind: input, shape index: {}]   ;;  %s1108_s2 = inlined_call_operand.hbm [shape: f32[8,128], index: 2, kind: input, shape index: {}]   ;;  %s1109_s3 = inlined_call_operand.vmem [shape: f32[8,128], index: 3, kind: input, shape index: {}]   ;;  %s1110_s4 = inlined_call_operand.vmem [shape: f32[1,128], index: 4, kind: input, shape index: {}]   ;;  %s1111_s5 = inlined_call_operand.vmem [shape: f32[2,17,128], index: 5, kind: output, shape index: {}]  }
   0x1   :  { %12 = vsyncpa [#allocation3 + $0x1], 0 }
   0x2   :  { %13 = vsyncpa [#allocation5], 0  ;;  %s915_s18 = smov 0   ;;  %s917_s19 = smov 0  }
   0x3   :  { %s919_s20 = smov 0   ;;  %s921_s21 = smov 0  }
   0x4 LB: > { %s934_s22 = sadd.s32 4294967295, %s874_s21   ;;  %p39_p0 = scmp.ne.s32.totalorder %s866_s19, %s862_s18  ;;  %s874_s21 = sphi %s921_s21, %s1126_s21   ;;  %s870_s20 = sphi %s919_s20, %s1125_s20   ;;  %s866_s19 = sphi %s917_s19, %s1124_s19   ;;  %s862_s18 = sphi %s915_s18, %s1123_s18  }
   0x5   : > { %p1112_p1 = scmp.eq.s32.totalorder %s934_s22, 0  ;;  %p643_p2 = scmp.ge.s32.totalorder %s874_s21, 1 }
   0x6   : > { %p160_p3 = scmp.lt.s32.totalorder %s874_s21, 3  ;;  %s876_s25 = smov [#allocation4]  }
   0x7   : > { %p942_p4 = por %p1112_p1, %p39_p0  ;;  %s172_s26 = sshll.u32 %s876_s25, 4  ;;  %s173_s26 = int_to_ptr.vmem [resolvable:$true] %s172_s26 }
   0x8   : > { %p946_p5 = pnand %p643_p2, %p160_p3  ;;  %s877_s28 = smov [#allocation6]  }
   0x9   : > { %s1115_s23 = scalar_select %p942_p4, 1, 0 }
   0xa   : > { %s1116_s24 = scalar_select %p946_p5, 1, 0 }
   0xb   : > { %p689_p6 = pneg %p946_p5  ;;  %s186_s29 = sshll.u32 %s877_s28, 4  ;;  %s958_s29 = int_to_ptr.vmem [resolvable:$true] %s186_s29 }
   0xc   : > { %s750_s7 = scalar_lea.hbm %s1107_s1, 512 }
   0xd   : > { %p954_p7 = pnand %p689_p6, %p1112_p1  ;;  %p751_p8 = scmp.ne.s32.totalorder %s1107_s1, %s750_s7 }
   0xe   : > { %p757_p12 = scmp.lt.u32.totalorder %s750_s7, %s1107_s1 }
   0xf   : > { %p752_p9 = pneg %p954_p7 }
  0x11   : > { %p753_p10 = pnand %p752_p9, %p751_p8 }
  0x13   : > { %p754_p11 = pneg %p753_p10 }
  0x15   : > { %p759_p13 = pnand %p757_p12, %p754_p11 }
  0x17   : > { %762 = shalt.err (!%p759_p13)
}
  0x18   : > { %s763_s12 = scalar_lea.vmem %s173_s26, 512  ;;  %p771_p6 = scmp.lt.s32.totalorder %s173_s26, %s173_s26 }
  0x19   : > { %p764_p0 = scmp.ne.s32.totalorder %s173_s26, %s763_s12  ;;  %p772_p1 = scmp.lt.s32.totalorder %s763_s12, %s763_s12 }
  0x1b   : > { %p766_p2 = pnand %p764_p0, %p752_p9  ;;  %p773_p4 = por %p772_p1, %p771_p6 }
  0x1d   : > { %p767_p3 = pneg %p766_p2 }
  0x1f   : > { %p774_p5 = pnand %p773_p4, %p767_p3 }
  0x21   : > { %777 = shalt.err (!%p774_p5)
}
  0x22   : > { %s878_s13 = smov 64   ;;  %s879_s14 = smov 4  }
  0x23   : > { %692 = dma.hbm_to_vmem [thread:$0]  (!%p954_p7), %s1107_s1, 512, %s173_s26, [#allocation5], %s878_s13, %s878_s13, %s879_s14  }
  0x24   : > { %s778_s25 = scalar_lea.hbm %s1108_s2, 128 }
  0x25   : > { %p779_p8 = scmp.ne.s32.totalorder %s1108_s2, %s778_s25  ;;  %p785_p5 = scmp.lt.u32.totalorder %s778_s25, %s1108_s2 }
  0x27   : > { %p781_p1 = pnand %p779_p8, %p752_p9 }
  0x29   : > { %p782_p4 = pneg %p781_p1 }
  0x2b   : > { %p787_p10 = pnand %p785_p5, %p782_p4 }
  0x2d   : > { %790 = shalt.err (!%p787_p10)
}
  0x2e   : > { %s791_s26 = scalar_lea.vmem %s958_s29, 128  ;;  %p799_p0 = scmp.lt.s32.totalorder %s958_s29, %s958_s29 }
  0x2f   : > { %p792_p11 = scmp.ne.s32.totalorder %s958_s29, %s791_s26  ;;  %p800_p2 = scmp.lt.s32.totalorder %s791_s26, %s791_s26 }
  0x31   : > { %p794_p12 = pnand %p792_p11, %p752_p9  ;;  %p801_p3 = por %p800_p2, %p799_p0 }
  0x33   : > { %p795_p13 = pneg %p794_p12 }
  0x35   : > { %p802_p6 = pnand %p801_p3, %p795_p13 }
  0x37   : > { %805 = shalt.err (!%p802_p6)
}
  0x38   : > { %695 = dma.hbm_to_vmem [thread:$0]  (!%p954_p7), %s1108_s2, 128, %s958_s29, [#allocation5]  }
  0x39   : > { %s1008_s10 = sadd.s32 1, %s874_s21   ;;  %s26_s11 = sadd.s32 1, %s870_s20 }
  0x3a   : > { %s23_s27 = ssub.s32 %s874_s21, %s1008_s10  ;;  %p33_p9 = scmp.ne.s32.totalorder %s870_s20, %s866_s19 }
  0x3b   : > { %p24_p8 = scmp.eq.s32.totalorder %s23_s27, 0  ;;  %p34_p1 = scmp.eq.s32.totalorder %s874_s21, 0 }
  0x3c   : > { %p702_p4 = scmp.lt.s32.totalorder %s874_s21, 2  ;;  %s203_s12 = sand.u32 1, %s870_s20  }
  0x3d   : > { %s1019_s13 = scalar_select %p24_p8, %s870_s20, %s26_s11  }
  0x3e   : > { %p35_p5 = por %p34_p1, %p33_p9  ;;  %s647_s14 = sshll.u32 %s203_s12, 3 }
  0x3f   : > { %s648_s15 = sshll.u32 %s874_s21, 7  ;;  %s207_s29 = scalar_lea.vmem [#allocation2], %s647_s14 }
  0x40   : > { %s1025_s18 = scalar_lea.hbm %s1106_s0, %s648_s15  ;;  %s214_s25 = sshll.u32 %s207_s29, 4  ;;  %s1031_s25 = int_to_ptr.vmem [resolvable:$true] %s214_s25 }
  0x41   : > { %p1027_p7 = pnand %p702_p4, %p35_p5  ;;  %s204_s21 = scalar_lea.sflag [#allocation3], %s203_s12 }
  0x42   : > { %s806_s30 = scalar_lea.hbm %s1025_s18, 128  ;;  %s811_s26 = scalar_lea.hbm %s1106_s0, 256 }
  0x43   : > { %p807_p10 = scmp.ne.s32.totalorder %s1025_s18, %s806_s30  ;;  %p808_p11 = pneg %p1027_p7 }
  0x44   : > { %p812_p0 = scmp.lt.u32.totalorder %s1025_s18, %s1106_s0  ;;  %p813_p2 = scmp.lt.u32.totalorder %s811_s26, %s806_s30 }
  0x45   : > { %p809_p12 = pnand %p808_p11, %p807_p10  ;;  %p815_p6 = scmp.lt.u32.totalorder %s806_s30, %s1025_s18 }
  0x46   : > { %p814_p3 = por %p813_p2, %p812_p0 }
  0x47   : > { %p810_p13 = pneg %p809_p12 }
  0x48   : > { %p816_p9 = por %p815_p6, %p814_p3 }
  0x4a   : > { %p817_p8 = pnand %p816_p9, %p810_p13 }
  0x4c   : > { %820 = shalt.err (!%p817_p8)
}
  0x4d   : > { %s821_s11 = scalar_lea.vmem %s1031_s25, 128  ;;  %s880_s27 = smov [#allocation2]  }
  0x4e   : > { %p822_p1 = scmp.ne.s32.totalorder %s1031_s25, %s821_s11  ;;  %s826_s12 = sshll.u32 %s880_s27, 4  ;;  %s827_s12 = int_to_ptr.vmem [resolvable:$false] %s826_s12 }
  0x4f   : > { %s828_s14 = scalar_lea.vmem %s827_s12, 256  ;;  %p829_p10 = scmp.lt.s32.totalorder %s1031_s25, %s827_s12 }
  0x50   : > { %p824_p4 = pnand %p822_p1, %p808_p11  ;;  %p830_p12 = scmp.lt.s32.totalorder %s828_s14, %s821_s11 }
  0x52   : > { %p825_p5 = pneg %p824_p4  ;;  %p831_p0 = por %p830_p12, %p829_p10 }
  0x54   : > { %p832_p2 = pnand %p831_p0, %p825_p5 }
  0x56   : > { %835 = shalt.err (!%p832_p2)
}
  0x57   : > { %699 = dma.hbm_to_vmem [thread:$0]  (!%p1027_p7), %s1025_s18, 128, %s1031_s25, %s204_s21  }
  0x58   : > { %p1119_p13 = scmp.ne.s32.totalorder %s1116_s24, 0 }
  0x59   : > { %s225_s15 = sand.u32 (!%p1119_p13), 1, %s866_s19   ;;  %p1120_p11 = scmp.ne.s32.totalorder (!%p1119_p13), %s1115_s23, 0 }
  0x5a   : > { %223 = sbr.rel (%p1119_p13) target bundleno = 352 (0x160), region = 40  ;;  %s650_s16 = sshll.u32 (!%p1119_p13), %s225_s15, 3 }
  0x5b   : > { %s226_s17 = scalar_lea.sflag (!%p1119_p13), [#allocation3], %s225_s15  ;;  %s229_s29 = scalar_lea.vmem (!%p1119_p13), [#allocation2], %s650_s16 }
  0x61   : > { %853 = dma.done.wait (%p1120_p11), %s226_s17, 128  }
  0x62   : > { %855 = vsyncadd (%p1120_p11), %s226_s17, 4294967168  ;;  %p1121_p3 = scmp.eq.s32.totalorder %s934_s22, 0 }
  0x64   : > { %857 = dma.done.wait (%p1121_p3), [#allocation5], 640   ;;  %p1122_p6 = pmov %p1121_p3 }
  0x65   : > { %v881_v0 = vmov 0.0   ;;  %vm882_vm0 = vmmov 0   ;;  %v745_v1 = vld [vmem:[#allocation4] sm:$0xff]   ;;  %v746_v2 = vld [vmem:[#allocation4 + $0x8] sm:$0xff]   ;;  %v747_v3 = vld [vmem:[#allocation4 + $0x10] sm:$0xff]   ;;  %vm304_vm1 = vcmask 523264   ;;  %v356_v10 = vlaneseq }
  0x66   : > { %859 = vsyncadd (%p1122_p6), [#allocation5], 4294966656  ;;  %666 = vmatprep.subr.bf16.mxu0 %v881_v0  ;;  %674 = vmatprep.mubr.msk.bf16.mxu0 %vm882_vm0, %v881_v0  ;;  %v748_v4 = vld [vmem:[#allocation4 + $0x18] sm:$0xff]   ;;  %p264_p7 = scmp.lt.s32.totalorder %s934_s22, 1  ;;  %v508_v7 = vld [vmem:[%s1110_s4] sm:$0x1] }
  0x67   : > { %667 = vmatpush3.bf16.msra.mxu0 %v745_v1  ;;  %v270_v5 = vld [vmem:[%s229_s29] sm:$0xff]  ;;  %v883_v8 = vmov 1966171168   ;;  %v357_v12 = vshrl.u32 %v356_v10, 7  ;;  %v348_v17 = vld [vmem:[#allocation6] sm:$0xff]  ;;  %vm499_vm2 = vcmask 1040384  }
  0x68   : > { %668 = vmatprep.subr.bf16.mxu0 %v881_v0  ;;  %v271_v6 = vpack.c.bf16 %v270_v5, %v270_v5  ;;  %s1128_s22 = smov (!%p264_p7, %s934_s22), 1  ;;  %v354_v9 = vunpack.c.l.s4 %v883_v8  ;;  %v350_v13 = vld [vmem:[%s1109_s3] sm:$0xff]  ;;  %v884_v31 = vmov 1983009808  }
  0x69   : > { %s678_s23 = smul.u32 24, %s1128_s22  ;;  %v352_v14 = vcombine.high %v350_v13, %v350_v13  ;;  %v461_v30 = vsub.s32 0, %v357_v12  ;;  %v521_v32 = vunpack.c.l.s4 %v884_v31 }
  0x6a   : > { %v355_v11 = vunpack.c.0.s8 %v354_v9 }
  0x6b   : > { %669 = vmatpush3.bf16.msra.mxu0 %v746_v2  ;;  %s1074_s25 = scalar_lea.vmem %s1111_s5, %s678_s23  ;;  %v522_v45 = vunpack.c.0.s8 %v521_v32 }
  0x6c   : > { %670 = vmatprep.subr.bf16.mxu0 %v881_v0  ;;  %509 = vst [vmem:[%s1074_s25] sm:$0x1] %v508_v7  ;;  %v358_v15 = vsub.s32 %v355_v11, %v357_v12 }
  0x6d   : > { %v525_v61 = vsub.s32 %v522_v45, %v357_v12 }
  0x6e   : > { %v359_v16 = vrot.slane %v350_v13, %v358_v15  ;;  %v366_v18 = vrot.slane %v352_v14, %v358_v15 }
  0x6f   : > { %671 = vmatpush3.bf16.msra.mxu0 %v747_v3 }
  0x70   : > { %672 = vmatprep.subr.bf16.mxu0 %v881_v0  ;;  %v367_v20 = vcombine.high %v359_v16, %v359_v16  ;;  %v368_v23 = vcombine.high %v366_v18, %v366_v18  ;;  %v375_v24 = vrot.slane %v359_v16, %v358_v15  ;;  %v382_v36 = vrot.slane %v366_v18, %v358_v15 }
  0x72   : > { %v389_v29 = vrot.slane %v367_v20, %v358_v15  ;;  %v396_v37 = vrot.slane %v368_v23, %v358_v15  ;;  %v397_v38 = vcombine.high %v375_v24, %v375_v24  ;;  %v398_v50 = vcombine.high %v382_v36, %v382_v36 }
  0x73   : > { %673 = vmatpush3.bf16.msra.mxu0 %v748_v4 }
  0x74   : > { %v399_v43 = vcombine.high %v389_v29, %v389_v29  ;;  %v400_v51 = vcombine.high %v396_v37, %v396_v37 }
  0x76   : > { %675 = vmatmul.mubr.msk.bf16.vlgmr.msra.gmra.mrb[0].mxu0 %vm304_vm1, %v271_v6 }
 0x149   : > { %v342_v19 = vpop.f32.mrb[0].mxu0 }
 0x14a   : > { %v349_v21 = vadd.f32 %v348_v17, %v342_v19  ;;  %v676_v22 = vpop.f32.mrb[1].mxu0 }
 0x14b   : > { %v345_v25 = vpop.f32.mrb[2].mxu0 }
 0x14c   : > { %v410_v26 = vcombine.high %v349_v21, %v349_v21  ;;  %v417_v27 = vrot.slane %v349_v21, %v358_v15  ;;  %v677_v28 = vpop.f32.mrb[3].mxu0 }
 0x14e   : > { %v424_v33 = vrot.slane %v410_v26, %v358_v15  ;;  %v425_v34 = vcombine.high %v417_v27, %v417_v27  ;;  %v433_v35 = vrot.slane %v417_v27, %v358_v15 }
 0x150   : > { %v426_v39 = vcombine.high %v424_v33, %v424_v33  ;;  %v440_v40 = vrot.slane %v424_v33, %v358_v15  ;;  %v447_v41 = vrot.slane %v425_v34, %v358_v15  ;;  %v455_v42 = vcombine.high %v433_v35, %v433_v35 }
 0x151   : > { %v462_v44 = vrot.slane %v433_v35, %v461_v30 }
 0x152   : > { %v454_v46 = vrot.slane %v426_v39, %v358_v15  ;;  %v456_v47 = vcombine.high %v440_v40, %v440_v40  ;;  %v457_v48 = vcombine.high %v447_v41, %v447_v41  ;;  %v466_v49 = vrot.slane %v447_v41, %v461_v30 }
 0x153   : > { %v470_v52 = vrot.slane %v455_v42, %v461_v30  ;;  %v478_v53 = vrot.slane %v440_v40, %v461_v30  ;;  %v500_v58 = vsel %vm499_vm2, %v375_v24, %v462_v44 }
 0x154   : > { %v458_v54 = vcombine.high %v454_v46, %v454_v46  ;;  %v474_v55 = vrot.slane %v457_v48, %v461_v30  ;;  %v482_v56 = vrot.slane %v454_v46, %v461_v30  ;;  %v486_v57 = vrot.slane %v456_v47, %v461_v30 }
 0x155   : > { %v501_v59 = vsel %vm499_vm2, %v389_v29, %v466_v49  ;;  %v502_v60 = vsel %vm499_vm2, %v397_v38, %v470_v52  ;;  %v504_v0 = vsel %vm499_vm2, %v382_v36, %v478_v53 }
 0x156   : > { %v490_v62 = vrot.slane %v458_v54, %v461_v30  ;;  %v503_v63 = vsel %vm499_vm2, %v399_v43, %v474_v55  ;;  %v505_v1 = vsel %vm499_vm2, %v396_v37, %v482_v56  ;;  %v518_v2 = vcombine.low %v500_v58, %v501_v59 }
 0x157   : > { %v519_v3 = vcombine.low %v502_v60, %v503_v63  ;;  %v535_v4 = vcombine.low %v504_v0, %v505_v1  ;;  %v506_v5 = vsel %vm499_vm2, %v398_v50, %v486_v57 }
 0x158   : > { %v507_v6 = vsel %vm499_vm2, %v400_v51, %v490_v62  ;;  %v526_v7 = vrot.slane %v518_v2, %v525_v61 }
 0x159   : > { %v533_v8 = vrot.slane %v519_v3, %v525_v61  ;;  %v536_v9 = vcombine.low %v506_v5, %v507_v6  ;;  %v543_v11 = vrot.slane %v535_v4, %v525_v61 }
 0x15b   : > { %v534_v10 = vcombine.low %v526_v7, %v533_v8  ;;  %v550_v12 = vrot.slane %v536_v9, %v525_v61 }
 0x15d   : > { %v551_v13 = vcombine.low %v543_v11, %v550_v12  ;;  %554 = vst [vmem:[%s1074_s25 + $0x1] sm:$0xff] %v534_v10 }
 0x15f   : > { %555 = vst [vmem:[%s1074_s25 + $0x9] sm:$0xff] %v551_v13 }
 0x160 PF: > { %p16_p9 = scmp.ge.s32.totalorder %s1008_s10, 4   ;;  %s1123_s18 = smov %s866_s19 }
 0x161   : > { %s1124_s19 = smov %s870_s20  ;;  %s1125_s20 = smov %s1019_s13 }
 0x162   : > { %s1126_s21 = smov %s1008_s10  ;;  %18 = sbr.rel (!%p16_p9) target bundleno = 4 (0x4), region = 88 }
 0x169   :  { %577 = vsyncpa [#allocation3], 1 }
 0x16a   :  { %579 = vsyncpa [#allocation3 + $0x1], 1 }
 0x16b   :  { %580 = vsyncpa [#allocation5], 1 }

</bundles_post_ra>
